<compile_context>
chip_gen: v6e
topology: v6e:2x2x1
jax: 0.10.0
libtpu: 0.0.40
codegen_flags: <defaults>
</compile_context>

<pallas_src>
import functools
from typing import NamedTuple

import jax
import jax.numpy as jnp
from jax.experimental import pallas as pl
from jax.experimental.pallas import tpu as pltpu


def _round_up(x, m):
    return (x + m - 1) // m * m


def _largest_divisor_tile(dim, cap, unit):
    """Largest multiple of `unit` that divides `dim` (itself a multiple of unit) and is <= cap."""
    best = unit
    n = dim // unit
    for d in range(1, n + 1):
        if n % d == 0 and d * unit <= cap:
            best = d * unit
    return best


_TM_MAX = 512
_TN_MAX = 512
_TK_MAX = 2048
_VMEM_LIMIT = 48 * 1024 * 1024   # safe on v7x (64 MiB physical) and generous on v5e/v6e


class ConvConfig(NamedTuple):
    kh: int
    kw: int
    cin: int
    cout: int
    stride: int
    padding: int
    K: int
    Kp: int
    Np: int
    tn: int
    tk: int


# ----------------------------------------------------------------------------
# Pallas kernels: X(bf16) @ W(bf16, BN-scale pre-folded) + bias, ReLU, bf16 out
# ----------------------------------------------------------------------------
def _conv_matmul_kernel(x_ref, w_ref, b_ref, o_ref, *, apply_relu):
    # Single K step: no accumulator scratch needed.
    y = jnp.dot(x_ref[...], w_ref[...], preferred_element_type=jnp.float32)
    y = y + b_ref[...]
    if apply_relu:
        y = jnp.maximum(y, 0.0)
    o_ref[...] = y.astype(o_ref.dtype)


def _conv_matmul_acc_kernel(x_ref, w_ref, b_ref, o_ref, acc_ref, *, apply_relu):
    # General K-tiled path with f32 VMEM accumulator (grid = (n, m, k), k innermost).
    @pl.when(pl.program_id(2) == 0)
    def _():
        acc_ref[...] = jnp.zeros_like(acc_ref)

    acc_ref[...] += jnp.dot(x_ref[...], w_ref[...], preferred_element_type=jnp.float32)

    @pl.when(pl.program_id(2) == pl.num_programs(2) - 1)
    def _():
        y = acc_ref[...] + b_ref[...]
        if apply_relu:
            y = jnp.maximum(y, 0.0)
        o_ref[...] = y.astype(o_ref.dtype)


def _fused_conv_matmul(xp, wp, bp, *, tm, tn, tk, apply_relu=True, out_dtype=jnp.bfloat16):
    """xp:(Mp,Kp) bf16, wp:(Kp,Np) bf16 (BN scale folded in), bp:(1,Np) f32."""
    Mp, Kp = xp.shape
    Np = wp.shape[1]
    n_m, n_n, n_k = Mp // tm, Np // tn, Kp // tk

    if n_k == 1:
        # Grid (n, m): W's block index is independent of m -> W stays resident in VMEM.
        return pl.pallas_call(
            functools.partial(_conv_matmul_kernel, apply_relu=apply_relu),
            out_shape=jax.ShapeDtypeStruct((Mp, Np), out_dtype),
            grid_spec=pltpu.PrefetchScalarGridSpec(
                num_scalar_prefetch=0,
                grid=(n_n, n_m),
                in_specs=[
                    pl.BlockSpec((tm, Kp), lambda j, i: (i, 0)),
                    pl.BlockSpec((Kp, tn), lambda j, i: (0, j)),
                    pl.BlockSpec((1, tn), lambda j, i: (0, j)),
                ],
                out_specs=pl.BlockSpec((tm, tn), lambda j, i: (i, j)),
            ),
            compiler_params=pltpu.CompilerParams(
                dimension_semantics=("parallel", "parallel"),
                vmem_limit_bytes=_VMEM_LIMIT,
            ),
        )(xp, wp, bp)

    return pl.pallas_call(
        functools.partial(_conv_matmul_acc_kernel, apply_relu=apply_relu),
        out_shape=jax.ShapeDtypeStruct((Mp, Np), out_dtype),
        grid_spec=pltpu.PrefetchScalarGridSpec(
            num_scalar_prefetch=0,
            grid=(n_n, n_m, n_k),
            in_specs=[
                pl.BlockSpec((tm, tk), lambda j, i, k: (i, k)),
                pl.BlockSpec((tk, tn), lambda j, i, k: (k, j)),
                pl.BlockSpec((1, tn), lambda j, i, k: (0, j)),
            ],
            out_specs=pl.BlockSpec((tm, tn), lambda j, i, k: (i, j)),
            scratch_shapes=[pltpu.VMEM((tm, tn), jnp.float32)],
        ),
        compiler_params=pltpu.CompilerParams(
            dimension_semantics=("parallel", "parallel", "arbitrary"),
            vmem_limit_bytes=_VMEM_LIMIT,
        ),
    )(xp, wp, bp)


# ----------------------------------------------------------------------------
# Parameter preparation (done once, outside the per-forward path)
#   - OIHW weight -> (K, N) matmul layout, BN scale folded in, bf16, 128-padded
#   - BN bias folded to a (1, Np) f32 vector
#   - returns (array params, static int config)
# ----------------------------------------------------------------------------
def prepare_basic_conv2d_params(w_oihw, gamma, beta, running_mean, running_var,
                                *, stride=1, padding=1, eps=1e-3):
    Cout, Cin, kh, kw = (int(d) for d in w_oihw.shape)
    K = kh * kw * Cin
    Kp = _round_up(K, 128)            # lane minimum only — no pad-to-tile
    Np = _round_up(Cout, 128)
    tk = _largest_divisor_tile(Kp, _TK_MAX, 128)
    tn = _largest_divisor_tile(Np, _TN_MAX, 128)

    # Inference-mode BN folding: y = conv(x) * s + b
    s = (gamma / jnp.sqrt(running_var + eps)).astype(jnp.float32)
    b = (beta.astype(jnp.float32) - running_mean.astype(jnp.float32) * s)

    # (Cout,Cin,kh,kw) -> (kh,kw,Cin,Cout) -> (K, Cout); fold scale, cast bf16, pad.
    w_mat = jnp.transpose(w_oihw.astype(jnp.float32), (2, 3, 1, 0)).reshape(K, Cout)
    w_mat = w_mat * s[None, :]
    wp = jnp.pad(w_mat, ((0, Kp - K), (0, Np - Cout))).astype(jnp.bfloat16)
    bp = jnp.pad(b[None, :], ((0, 0), (0, Np - Cout)))

    cfg = ConvConfig(kh=kh, kw=kw, cin=Cin, cout=Cout, stride=stride, padding=padding,
                     K=K, Kp=Kp, Np=Np, tn=tn, tk=tk)
    params = dict(w=wp, bias=bp)
    return params, cfg


# ----------------------------------------------------------------------------
# im2col patch extraction on an already-bf16 NHWC input (static kernel/stride/pad)
# ----------------------------------------------------------------------------
def _extract_patches(x_nhwc, kh, kw, stride, pad):
    B, H, W, C = x_nhwc.shape
    xp = jnp.pad(x_nhwc, ((0, 0), (pad, pad), (pad, pad), (0, 0)))
    Ho = (H + 2 * pad - kh) // stride + 1
    Wo = (W + 2 * pad - kw) // stride + 1
    taps = [xp[:, i:i + stride * Ho:stride, j:j + stride * Wo:stride, :]
            for i in range(kh) for j in range(kw)]
    # (B, Ho, Wo, kh*kw, C): tap-major / channel-minor, matching the weight layout.
    return jnp.stack(taps, axis=3), Ho, Wo


# ----------------------------------------------------------------------------
# BasicConv2d forward
# ----------------------------------------------------------------------------
def basic_conv2d_forward_nhwc(x_nhwc, params, *, cfg):
    x = x_nhwc.astype(jnp.bfloat16)                 # bf16 BEFORE patch extraction
    patches, Ho, Wo = _extract_patches(x, cfg.kh, cfg.kw, cfg.stride, cfg.padding)
    B = x.shape[0]
    M = B * Ho * Wo
    X = patches.reshape(M, cfg.K)

    Mp = _round_up(M, 16)                           # bf16 sublane minimum only
    tm = _largest_divisor_tile(Mp, _TM_MAX, 16)
    if tm < 128 and Mp > 256:                       # avoid pathological tiny tiles
        tm = 256
        Mp = _round_up(M, tm)

    pad_m, pad_k = Mp - M, cfg.Kp - cfg.K
    if pad_m or pad_k:
        X = jnp.pad(X, ((0, pad_m), (0, pad_k)))

    y = _fused_conv_matmul(X, params["w"], params["bias"],
                           tm=tm, tn=cfg.tn, tk=cfg.tk,
                           apply_relu=True, out_dtype=jnp.bfloat16)
    return y[:M, :cfg.cout].reshape(B, Ho, Wo, cfg.cout)


def basic_conv2d_forward(x_nchw, params, *, cfg):
    # NCHW in -> NCHW out to match the PyTorch module; prefer the NHWC entry point
    # above when the surrounding model can stay channels-last.
    x = jnp.transpose(x_nchw, (0, 2, 3, 1))
    y = basic_conv2d_forward_nhwc(x, params, cfg=cfg)
    return jnp.transpose(y, (0, 3, 1, 2)).astype(jnp.float32)


# ----------------------------------------------------------------------------
# Pure-JAX reference (correctness check only)
# ----------------------------------------------------------------------------
def _reference_forward(x_nchw, w_oihw, gamma, beta, mean, var, *, stride, padding, eps=1e-3):
    y = jax.lax.conv_general_dilated(
        x_nchw, w_oihw, window_strides=(stride, stride),
        padding=[(padding, padding), (padding, padding)],
        dimension_numbers=("NCHW", "OIHW", "NCHW"))
    s = (gamma / jnp.sqrt(var + eps)).reshape(1, -1, 1, 1)
    b = (beta - mean * gamma / jnp.sqrt(var + eps)).reshape(1, -1, 1, 1)
    return jnp.maximum(y * s + b, 0.0)


if __name__ == "__main__":
    key = jax.random.PRNGKey(0)
    k_x, k_w, k_g, k_b, k_m = jax.random.split(key, 5)

    # Small shapes consistent with the module: batch=2, in_channels=4, spatial=16,
    # out_channels=32, conv kwargs kernel_size=3, stride=1, padding=1.
    batch, cin, spatial, cout, ksize, stride, padding = 2, 4, 16, 32, 3, 1, 1

    x = jax.random.normal(k_x, (batch, cin, spatial, spatial), jnp.float32)
    fan_in = cin * ksize * ksize
    w = jax.random.normal(k_w, (cout, cin, ksize, ksize), jnp.float32) * (fan_in ** -0.5)
    gamma = 1.0 + 0.1 * jax.random.normal(k_g, (cout,), jnp.float32)
    beta = 0.05 * jax.random.normal(k_b, (cout,), jnp.float32)
    running_mean = 0.05 * jax.random.normal(k_m, (cout,), jnp.float32)
    running_var = jnp.ones((cout,), jnp.float32)

    params, cfg = prepare_basic_conv2d_params(
        w, gamma, beta, running_mean, running_var,
        stride=stride, padding=padding, eps=1e-3)

    # Static config is bound via partial (Python ints), only arrays are traced.
    fwd = jax.jit(functools.partial(basic_conv2d_forward, cfg=cfg))
    out = fwd(x, params)
    out = jax.block_until_ready(out)

    ref = _reference_forward(x, w, gamma, beta, running_mean, running_var,
                             stride=stride, padding=padding, eps=1e-3)

    assert out.shape == (batch, cout, spatial, spatial), out.shape
    assert bool(jnp.all(jnp.isfinite(out)))
    # bf16 MXU inputs + bf16 output with f32 accumulation; K=36 keeps error small.
    assert bool(jnp.allclose(out, ref, rtol=5e-2, atol=5e-2)), \
        float(jnp.max(jnp.abs(out - ref)))
    print("KERNEL_OK")
</pallas_src>

<mosaic_0001>
module attributes {stable_mosaic.version = 11 : i64} {
  func.func @_conv_matmul_kernel(%arg0: i32, %arg1: i32, %arg2: memref<512x128xbf16, #tpu.memory_space<vmem>>, %arg3: memref<128x128xbf16, #tpu.memory_space<vmem>>, %arg4: memref<1x128xf32, #tpu.memory_space<vmem>>, %arg5: memref<512x128xbf16, #tpu.memory_space<vmem>>) attributes {dimension_semantics = [#tpu.dimension_semantics<parallel>, #tpu.dimension_semantics<parallel>], iteration_bounds = array<i64: 1, 1>, scalar_prefetch = 0 : i64, scratch_operands = 0 : i64, tpu.core_type = #tpu.core_type<tc>, window_params = [{transform_indices = @transform_0, window_bounds = array<i64: 512, 128>}, {transform_indices = @transform_1, window_bounds = array<i64: 128, 128>}, {transform_indices = @transform_2, window_bounds = array<i64: 1, 128>}, {transform_indices = @transform_3, window_bounds = array<i64: 512, 128>}]} {
    %c0 = arith.constant 0 : index
    %c0_0 = arith.constant 0 : index
    %0 = vector.load %arg2[%c0, %c0_0] : memref<512x128xbf16, #tpu.memory_space<vmem>>, vector<512x128xbf16>
    %c0_1 = arith.constant 0 : index
    %c0_2 = arith.constant 0 : index
    %1 = vector.load %arg3[%c0_1, %c0_2] : memref<128x128xbf16, #tpu.memory_space<vmem>>, vector<128x128xbf16>
    %cst = arith.constant dense<0.000000e+00> : vector<512x128xf32>
    %2 = tpu.matmul %0, %1, %cst {dimension_numbers = #tpu.dot_dimension_numbers<[1], [0], [0], [1], [0, 0, 1, 1], [], []>} : vector<512x128xbf16>, vector<128x128xbf16>, vector<512x128xf32> -> vector<512x128xf32>
    %c0_3 = arith.constant 0 : index
    %c0_4 = arith.constant 0 : index
    %3 = vector.load %arg4[%c0_3, %c0_4] : memref<1x128xf32, #tpu.memory_space<vmem>>, vector<1x128xf32>
    %4 = vector.broadcast %3 : vector<1x128xf32> to vector<512x128xf32>
    %5 = arith.addf %2, %4 : vector<512x128xf32>
    %cst_5 = arith.constant 0.000000e+00 : f32
    %6 = vector.broadcast %cst_5 : f32 to vector<512x128xf32>
    %7 = arith.maximumf %5, %6 : vector<512x128xf32>
    %8 = arith.truncf %7 : vector<512x128xf32> to vector<512x128xbf16>
    %c0_6 = arith.constant 0 : index
    %c0_7 = arith.constant 0 : index
    %9 = vector.load %arg5[%c0_6, %c0_7] : memref<512x128xbf16, #tpu.memory_space<vmem>>, vector<512x128xbf16>
    tpu.vector_store %arg5[%c0_6, %c0_7], %8 {strides = array<i32>} : memref<512x128xbf16, #tpu.memory_space<vmem>>, vector<512x128xbf16>,
    return
  }
  func.func @transform_0(%arg0: i32, %arg1: i32) -> (i32, i32) {
    %c0_i32 = arith.constant 0 : i32
    %c0_i32_0 = arith.constant 0 : i32
    return %arg1, %c0_i32 : i32, i32
  }
  func.func @transform_1(%arg0: i32, %arg1: i32) -> (i32, i32) {
    %c0_i32 = arith.constant 0 : i32
    %c0_i32_0 = arith.constant 0 : i32
    return %c0_i32, %arg0 : i32, i32
  }
  func.func @transform_2(%arg0: i32, %arg1: i32) -> (i32, i32) {
    %c0_i32 = arith.constant 0 : i32
    %c0_i32_0 = arith.constant 0 : i32
    return %c0_i32, %arg0 : i32, i32
  }
  func.func @transform_3(%arg0: i32, %arg1: i32) -> (i32, i32) {
    %c0_i32 = arith.constant 0 : i32
    return %arg1, %arg0 : i32, i32
  }
}

</mosaic_0001>

<bundles_post_ra>
// kernel: basic_conv2d_forward.1
= control target key start
LH: loop header
LB: loop body
LE: loop exit
PB: predicated region body
PF: predicated region fallthrough
CT: control target
= control target key end

     0   :  { %s1860_s1 = inlined_call_operand.vmem [shape: bf16[128,128], index: 1, kind: input, shape index: {}]   ;;  %s1861_s0 = inlined_call_operand.vmem [shape: bf16[512,128], index: 0, kind: input, shape index: {}]   ;;  %s1862_s2 = inlined_call_operand.vmem [shape: f32[1,128], index: 2, kind: input, shape index: {}]   ;;  %s1863_s3 = inlined_call_operand.vmem [shape: bf16[512,128], index: 3, kind: output, shape index: {}]  }
   0x1   :  { %v1515_v0 = vld [vmem:[%s1860_s1 + $0x38] sm:$0xff]   ;;  %v1516_v1 = vld [vmem:[%s1860_s1 + $0x30] sm:$0xff]   ;;  %v1517_v2 = vld [vmem:[%s1860_s1 + $0x28] sm:$0xff]  }
   0x2   :  { %1419 = vmatprep.subr.bf16.mxu0 %v1515_v0  ;;  %1499 = vmatprep.subr.bf16.mxu1 %v1515_v0  ;;  %v1518_v3 = vld [vmem:[%s1860_s1 + $0x20] sm:$0xff]   ;;  %v1519_v6 = vld [vmem:[%s1860_s1 + $0x18] sm:$0xff]   ;;  %v1520_v7 = vld [vmem:[%s1860_s1 + $0x10] sm:$0xff]  }
   0x3   :  { %1420 = vmatpush3.bf16.msra.mxu0 %v1515_v0  ;;  %1507 = vmatpush3.bf16.msra.mxu1 %v1515_v0  ;;  %v1523_v4 = vld [vmem:[%s1861_s0] sm:$0xff]   ;;  %v1521_v8 = vld [vmem:[%s1860_s1 + $0x8] sm:$0xff]   ;;  %v1527_v12 = vld [vmem:[%s1861_s0 + $0x10] sm:$0xff]  }
   0x4   :  { %1421 = vmatprep.subr.bf16.mxu0 %v1516_v1  ;;  %1500 = vmatprep.subr.bf16.mxu1 %v1516_v1  ;;  %v1524_v5 = vld [vmem:[%s1861_s0 + $0x80] sm:$0xff]   ;;  %v1525_v10 = vld [vmem:[%s1861_s0 + $0x8] sm:$0xff]   ;;  %v1528_v13 = vld [vmem:[%s1861_s0 + $0x90] sm:$0xff]  }
   0x5   :  { %1435 = vmatprep.mubr.bf16.mxu0 %v1523_v4  ;;  %1467 = vmatprep.mubr.bf16.mxu1 %v1524_v5  ;;  %v1522_v9 = vld [vmem:[%s1860_s1] sm:$0xff]   ;;  %v1526_v11 = vld [vmem:[%s1861_s0 + $0x88] sm:$0xff]   ;;  %v1529_v14 = vld [vmem:[%s1861_s0 + $0x18] sm:$0xff]  }
   0x6   :  { %v1530_v15 = vld [vmem:[%s1861_s0 + $0x98] sm:$0xff]   ;;  %v1531_v16 = vld [vmem:[%s1861_s0 + $0x20] sm:$0xff]   ;;  %v1533_v18 = vld [vmem:[%s1861_s0 + $0x28] sm:$0xff]  }
   0x7   :  { %1422 = vmatpush3.bf16.msra.mxu0 %v1516_v1  ;;  %1508 = vmatpush3.bf16.msra.mxu1 %v1516_v1  ;;  %v1532_v17 = vld [vmem:[%s1861_s0 + $0xa0] sm:$0xff]   ;;  %v1534_v19 = vld [vmem:[%s1861_s0 + $0xa8] sm:$0xff]   ;;  %v1535_v20 = vld [vmem:[%s1861_s0 + $0x30] sm:$0xff]  }
   0x8   :  { %1423 = vmatprep.subr.bf16.mxu0 %v1517_v2  ;;  %1501 = vmatprep.subr.bf16.mxu1 %v1517_v2  ;;  %v1536_v21 = vld [vmem:[%s1861_s0 + $0xb0] sm:$0xff]   ;;  %v1537_v22 = vld [vmem:[%s1861_s0 + $0x38] sm:$0xff]   ;;  %v1539_v24 = vld [vmem:[%s1861_s0 + $0x40] sm:$0xff]  }
   0x9   :  { %v1538_v23 = vld [vmem:[%s1861_s0 + $0xb8] sm:$0xff]   ;;  %v1540_v25 = vld [vmem:[%s1861_s0 + $0xc0] sm:$0xff]   ;;  %v1541_v26 = vld [vmem:[%s1861_s0 + $0x48] sm:$0xff]  }
   0xa   :  { %v1542_v27 = vld [vmem:[%s1861_s0 + $0xc8] sm:$0xff]   ;;  %v1543_v28 = vld [vmem:[%s1861_s0 + $0x50] sm:$0xff]   ;;  %v1545_v30 = vld [vmem:[%s1861_s0 + $0x58] sm:$0xff]  }
   0xb   :  { %1424 = vmatpush3.bf16.msra.mxu0 %v1517_v2  ;;  %1509 = vmatpush3.bf16.msra.mxu1 %v1517_v2  ;;  %v1544_v29 = vld [vmem:[%s1861_s0 + $0xd0] sm:$0xff]   ;;  %v1546_v31 = vld [vmem:[%s1861_s0 + $0xd8] sm:$0xff]   ;;  %v1547_v32 = vld [vmem:[%s1861_s0 + $0x60] sm:$0xff]  }
   0xc   :  { %1425 = vmatprep.subr.bf16.mxu0 %v1518_v3  ;;  %1502 = vmatprep.subr.bf16.mxu1 %v1518_v3  ;;  %v1548_v33 = vld [vmem:[%s1861_s0 + $0xe0] sm:$0xff]   ;;  %v1549_v34 = vld [vmem:[%s1861_s0 + $0x68] sm:$0xff]   ;;  %v1551_v36 = vld [vmem:[%s1861_s0 + $0x70] sm:$0xff]  }
   0xd   :  { %v1550_v35 = vld [vmem:[%s1861_s0 + $0xe8] sm:$0xff]   ;;  %v1552_v37 = vld [vmem:[%s1861_s0 + $0xf0] sm:$0xff]   ;;  %v1553_v38 = vld [vmem:[%s1861_s0 + $0x78] sm:$0xff]  }
   0xe   :  { %v1554_v39 = vld [vmem:[%s1861_s0 + $0xf8] sm:$0xff]   ;;  %v1698_v40 = vld [vmem:[%s1862_s2] ss:$0 sm:$0xff] }
   0xf   :  { %1426 = vmatpush3.bf16.msra.mxu0 %v1518_v3  ;;  %1510 = vmatpush3.bf16.msra.mxu1 %v1518_v3 }
  0x10   :  { %1427 = vmatprep.subr.bf16.mxu0 %v1519_v6  ;;  %1503 = vmatprep.subr.bf16.mxu1 %v1519_v6 }
  0x13   :  { %1428 = vmatpush3.bf16.msra.mxu0 %v1519_v6  ;;  %1511 = vmatpush3.bf16.msra.mxu1 %v1519_v6 }
  0x14   :  { %1429 = vmatprep.subr.bf16.mxu0 %v1520_v7  ;;  %1504 = vmatprep.subr.bf16.mxu1 %v1520_v7 }
  0x17   :  { %1430 = vmatpush3.bf16.msra.mxu0 %v1520_v7  ;;  %1512 = vmatpush3.bf16.msra.mxu1 %v1520_v7 }
  0x18   :  { %1431 = vmatprep.subr.bf16.mxu0 %v1521_v8  ;;  %1505 = vmatprep.subr.bf16.mxu1 %v1521_v8 }
  0x1b   :  { %1432 = vmatpush3.bf16.msra.mxu0 %v1521_v8  ;;  %1513 = vmatpush3.bf16.msra.mxu1 %v1521_v8 }
  0x1c   :  { %1433 = vmatprep.subr.bf16.mxu0 %v1522_v9  ;;  %1506 = vmatprep.subr.bf16.mxu1 %v1522_v9 }
  0x1f   :  { %1434 = vmatpush3.bf16.msra.mxu0 %v1522_v9  ;;  %1514 = vmatpush3.bf16.msra.mxu1 %v1522_v9 }
  0x22   :  { %1436 = vmatmul.mubr.bf16.vlgmr.msra.gmra.mxu0 %v1525_v10  ;;  %1468 = vmatmul.mubr.bf16.vlgmr.msra.gmra.mxu1 %v1526_v11 }
  0x23   :  { %1439 = vmatprep.mubr.bf16.mxu0 %v1527_v12  ;;  %1471 = vmatprep.mubr.bf16.mxu1 %v1528_v13 }
  0x2a   :  { %1440 = vmatmul.mubr.bf16.gmra.mxu0 %v1529_v14  ;;  %1472 = vmatmul.mubr.bf16.gmra.mxu1 %v1530_v15 }
  0x2b   :  { %1443 = vmatprep.mubr.bf16.mxu0 %v1531_v16  ;;  %1475 = vmatprep.mubr.bf16.mxu1 %v1532_v17 }
  0x32   :  { %1444 = vmatmul.mubr.bf16.gmra.mxu0 %v1533_v18  ;;  %1476 = vmatmul.mubr.bf16.gmra.mxu1 %v1534_v19 }
  0x33   :  { %1447 = vmatprep.mubr.bf16.mxu0 %v1535_v20  ;;  %1479 = vmatprep.mubr.bf16.mxu1 %v1536_v21 }
  0x3a   :  { %1448 = vmatmul.mubr.bf16.gmra.mxu0 %v1537_v22  ;;  %1480 = vmatmul.mubr.bf16.gmra.mxu1 %v1538_v23 }
  0x3b   :  { %1451 = vmatprep.mubr.bf16.mxu0 %v1539_v24  ;;  %1483 = vmatprep.mubr.bf16.mxu1 %v1540_v25 }
  0x42   :  { %1452 = vmatmul.mubr.bf16.gmra.mxu0 %v1541_v26  ;;  %1484 = vmatmul.mubr.bf16.gmra.mxu1 %v1542_v27 }
  0x43   :  { %1455 = vmatprep.mubr.bf16.mxu0 %v1543_v28  ;;  %1487 = vmatprep.mubr.bf16.mxu1 %v1544_v29 }
  0x4a   :  { %1456 = vmatmul.mubr.bf16.gmra.mxu0 %v1545_v30  ;;  %1488 = vmatmul.mubr.bf16.gmra.mxu1 %v1546_v31 }
  0x4b   :  { %1459 = vmatprep.mubr.bf16.mxu0 %v1547_v32  ;;  %1491 = vmatprep.mubr.bf16.mxu1 %v1548_v33 }
  0x52   :  { %1460 = vmatmul.mubr.bf16.gmra.mxu0 %v1549_v34  ;;  %1492 = vmatmul.mubr.bf16.gmra.mxu1 %v1550_v35 }
  0x53   :  { %1463 = vmatprep.mubr.bf16.mxu0 %v1551_v36  ;;  %1495 = vmatprep.mubr.bf16.mxu1 %v1552_v37 }
  0x5a   :  { %1464 = vmatmul.mubr.bf16.gmra.mxu0 %v1553_v38  ;;  %1496 = vmatmul.mubr.bf16.gmra.mxu1 %v1554_v39 }
  0xe2   :  { %v1437_v41 = vpop.f32.mrf.mxu0  ;;  %v1469_v42 = vpop.f32.mrf.mxu1 }
  0xe3   :  { %v385_v43 = vadd.f32 %v1437_v41, %v1698_v40  ;;  %v513_v44 = vadd.f32 %v1469_v42, %v1698_v40 }
  0xe4   :  { %v376_v45 = vpop.f32.mrf.mxu0  ;;  %v504_v46 = vpop.f32.mrf.mxu1 }
  0xe5   :  { %v377_v47 = vadd.f32 %v1698_v40, %v376_v45  ;;  %v505_v48 = vadd.f32 %v1698_v40, %v504_v46  ;;  %v633_v53 = vmax.f32 %v385_v43, 0.0  ;;  %v665_v54 = vmax.f32 %v513_v44, 0.0 }
  0xe6   :  { %v1438_v49 = vpop.f32.mrf.mxu0  ;;  %v1470_v50 = vpop.f32.mrf.mxu1 }
  0xe7   :  { %v388_v51 = vadd.f32 %v1438_v49, %v1698_v40  ;;  %v516_v52 = vadd.f32 %v1470_v50, %v1698_v40  ;;  %v631_v61 = vmax.f32 %v377_v47, 0.0  ;;  %v663_v62 = vmax.f32 %v505_v48, 0.0 }
  0xe8   :  { %v379_v55 = vpop.f32.mrf.mxu0  ;;  %v507_v56 = vpop.f32.mrf.mxu1 }
  0xe9   :  { %v634_v57 = vmax.f32 %v388_v51, 0.0  ;;  %v666_v58 = vmax.f32 %v516_v52, 0.0  ;;  %v380_v59 = vadd.f32 %v1698_v40, %v379_v55  ;;  %v508_v60 = vadd.f32 %v1698_v40, %v507_v56 }
  0xea   :  { %v1441_v63 = vpop.f32.mrf.mxu0  ;;  %v1473_v0 = vpop.f32.mrf.mxu1 }
  0xeb   :  { %v1196_v1 = vpack.c.bf16 %v634_v57, %v633_v53  ;;  %v1276_v2 = vpack.c.bf16 %v666_v58, %v665_v54  ;;  %v632_v3 = vmax.f32 %v380_v59, 0.0  ;;  %v664_v4 = vmax.f32 %v508_v60, 0.0 }
  0xec   :  { %v401_v5 = vadd.f32 %v1441_v63, %v1698_v40  ;;  %v529_v6 = vadd.f32 %v1473_v0, %v1698_v40  ;;  %v392_v7 = vpop.f32.mrf.mxu0  ;;  %v520_v8 = vpop.f32.mrf.mxu1 }
  0xed   :  { %1348 = vst [vmem:[%s1863_s3 + $0x8] sm:$0xff] %v1196_v1   ;;  %1364 = vst [vmem:[%s1863_s3 + $0x88] sm:$0xff] %v1276_v2   ;;  %v1191_v9 = vpack.c.bf16 %v632_v3, %v631_v61  ;;  %v1271_v10 = vpack.c.bf16 %v664_v4, %v663_v62  ;;  %v393_v11 = vadd.f32 %v1698_v40, %v392_v7 }
  0xee   :  { %v521_v12 = vadd.f32 %v1698_v40, %v520_v8  ;;  %v1442_v13 = vpop.f32.mrf.mxu0  ;;  %v1474_v14 = vpop.f32.mrf.mxu1  ;;  %v637_v17 = vmax.f32 %v401_v5, 0.0  ;;  %v669_v18 = vmax.f32 %v529_v6, 0.0 }
  0xef   :  { %1192 = vst [vmem:[%s1863_s3] sm:$0xff] %v1191_v9   ;;  %1363 = vst [vmem:[%s1863_s3 + $0x80] sm:$0xff] %v1271_v10   ;;  %v404_v15 = vadd.f32 %v1442_v13, %v1698_v40  ;;  %v532_v16 = vadd.f32 %v1474_v14, %v1698_v40  ;;  %v635_v25 = vmax.f32 %v393_v11, 0.0 }
  0xf0   :  { %v395_v19 = vpop.f32.mrf.mxu0  ;;  %v523_v20 = vpop.f32.mrf.mxu1  ;;  %v667_v26 = vmax.f32 %v521_v12, 0.0 }
  0xf1   :  { %v638_v21 = vmax.f32 %v404_v15, 0.0  ;;  %v670_v22 = vmax.f32 %v532_v16, 0.0  ;;  %v396_v23 = vadd.f32 %v1698_v40, %v395_v19  ;;  %v524_v24 = vadd.f32 %v1698_v40, %v523_v20 }
  0xf2   :  { %v1445_v27 = vpop.f32.mrf.mxu0  ;;  %v1477_v28 = vpop.f32.mrf.mxu1 }
  0xf3   :  { %v1206_v29 = vpack.c.bf16 %v638_v21, %v637_v17  ;;  %v1286_v30 = vpack.c.bf16 %v670_v22, %v669_v18  ;;  %v636_v31 = vmax.f32 %v396_v23, 0.0  ;;  %v668_v32 = vmax.f32 %v524_v24, 0.0 }
  0xf4   :  { %v417_v33 = vadd.f32 %v1445_v27, %v1698_v40  ;;  %v545_v34 = vadd.f32 %v1477_v28, %v1698_v40  ;;  %v408_v35 = vpop.f32.mrf.mxu0  ;;  %v536_v36 = vpop.f32.mrf.mxu1 }
  0xf5   :  { %1350 = vst [vmem:[%s1863_s3 + $0x18] sm:$0xff] %v1206_v29   ;;  %1366 = vst [vmem:[%s1863_s3 + $0x98] sm:$0xff] %v1286_v30   ;;  %v1201_v37 = vpack.c.bf16 %v636_v31, %v635_v25  ;;  %v1281_v38 = vpack.c.bf16 %v668_v32, %v667_v26  ;;  %v409_v39 = vadd.f32 %v1698_v40, %v408_v35 }
  0xf6   :  { %v537_v41 = vadd.f32 %v1698_v40, %v536_v36  ;;  %v1446_v42 = vpop.f32.mrf.mxu0  ;;  %v1478_v43 = vpop.f32.mrf.mxu1  ;;  %v641_v46 = vmax.f32 %v417_v33, 0.0  ;;  %v673_v47 = vmax.f32 %v545_v34, 0.0 }
  0xf7   :  { %1349 = vst [vmem:[%s1863_s3 + $0x10] sm:$0xff] %v1201_v37   ;;  %1365 = vst [vmem:[%s1863_s3 + $0x90] sm:$0xff] %v1281_v38   ;;  %v420_v44 = vadd.f32 %v1446_v42, %v1698_v40  ;;  %v548_v45 = vadd.f32 %v1478_v43, %v1698_v40  ;;  %v639_v54 = vmax.f32 %v409_v39, 0.0 }
  0xf8   :  { %v411_v48 = vpop.f32.mrf.mxu0  ;;  %v539_v49 = vpop.f32.mrf.mxu1  ;;  %v671_v55 = vmax.f32 %v537_v41, 0.0 }
  0xf9   :  { %v642_v50 = vmax.f32 %v420_v44, 0.0  ;;  %v674_v51 = vmax.f32 %v548_v45, 0.0  ;;  %v412_v52 = vadd.f32 %v1698_v40, %v411_v48  ;;  %v540_v53 = vadd.f32 %v1698_v40, %v539_v49 }
  0xfa   :  { %v1449_v56 = vpop.f32.mrf.mxu0  ;;  %v1481_v57 = vpop.f32.mrf.mxu1 }
  0xfb   :  { %v1216_v58 = vpack.c.bf16 %v642_v50, %v641_v46  ;;  %v1296_v59 = vpack.c.bf16 %v674_v51, %v673_v47  ;;  %v640_v60 = vmax.f32 %v412_v52, 0.0  ;;  %v672_v61 = vmax.f32 %v540_v53, 0.0 }
  0xfc   :  { %v433_v62 = vadd.f32 %v1449_v56, %v1698_v40  ;;  %v561_v63 = vadd.f32 %v1481_v57, %v1698_v40  ;;  %v424_v0 = vpop.f32.mrf.mxu0  ;;  %v552_v1 = vpop.f32.mrf.mxu1 }
  0xfd   :  { %1352 = vst [vmem:[%s1863_s3 + $0x28] sm:$0xff] %v1216_v58   ;;  %1368 = vst [vmem:[%s1863_s3 + $0xa8] sm:$0xff] %v1296_v59   ;;  %v1211_v2 = vpack.c.bf16 %v640_v60, %v639_v54  ;;  %v1291_v3 = vpack.c.bf16 %v672_v61, %v671_v55  ;;  %v425_v4 = vadd.f32 %v1698_v40, %v424_v0 }
  0xfe   :  { %v553_v5 = vadd.f32 %v1698_v40, %v552_v1  ;;  %v1450_v6 = vpop.f32.mrf.mxu0  ;;  %v1482_v7 = vpop.f32.mrf.mxu1  ;;  %v645_v10 = vmax.f32 %v433_v62, 0.0  ;;  %v677_v11 = vmax.f32 %v561_v63, 0.0 }
  0xff   :  { %1351 = vst [vmem:[%s1863_s3 + $0x20] sm:$0xff] %v1211_v2   ;;  %1367 = vst [vmem:[%s1863_s3 + $0xa0] sm:$0xff] %v1291_v3   ;;  %v436_v8 = vadd.f32 %v1450_v6, %v1698_v40  ;;  %v564_v9 = vadd.f32 %v1482_v7, %v1698_v40  ;;  %v643_v18 = vmax.f32 %v425_v4, 0.0 }
 0x100   :  { %v427_v12 = vpop.f32.mrf.mxu0  ;;  %v555_v13 = vpop.f32.mrf.mxu1  ;;  %v675_v19 = vmax.f32 %v553_v5, 0.0 }
 0x101   :  { %v646_v14 = vmax.f32 %v436_v8, 0.0  ;;  %v678_v15 = vmax.f32 %v564_v9, 0.0  ;;  %v428_v16 = vadd.f32 %v1698_v40, %v427_v12  ;;  %v556_v17 = vadd.f32 %v1698_v40, %v555_v13 }
 0x102   :  { %v1453_v20 = vpop.f32.mrf.mxu0  ;;  %v1485_v21 = vpop.f32.mrf.mxu1 }
 0x103   :  { %v1226_v22 = vpack.c.bf16 %v646_v14, %v645_v10  ;;  %v1306_v23 = vpack.c.bf16 %v678_v15, %v677_v11  ;;  %v644_v24 = vmax.f32 %v428_v16, 0.0  ;;  %v676_v25 = vmax.f32 %v556_v17, 0.0 }
 0x104   :  { %v449_v26 = vadd.f32 %v1453_v20, %v1698_v40  ;;  %v577_v27 = vadd.f32 %v1485_v21, %v1698_v40  ;;  %v440_v28 = vpop.f32.mrf.mxu0  ;;  %v568_v29 = vpop.f32.mrf.mxu1 }
 0x105   :  { %1354 = vst [vmem:[%s1863_s3 + $0x38] sm:$0xff] %v1226_v22   ;;  %1370 = vst [vmem:[%s1863_s3 + $0xb8] sm:$0xff] %v1306_v23   ;;  %v1221_v30 = vpack.c.bf16 %v644_v24, %v643_v18  ;;  %v1301_v31 = vpack.c.bf16 %v676_v25, %v675_v19  ;;  %v441_v32 = vadd.f32 %v1698_v40, %v440_v28 }
 0x106   :  { %v569_v33 = vadd.f32 %v1698_v40, %v568_v29  ;;  %v1454_v34 = vpop.f32.mrf.mxu0  ;;  %v1486_v35 = vpop.f32.mrf.mxu1  ;;  %v649_v38 = vmax.f32 %v449_v26, 0.0  ;;  %v681_v39 = vmax.f32 %v577_v27, 0.0 }
 0x107   :  { %1353 = vst [vmem:[%s1863_s3 + $0x30] sm:$0xff] %v1221_v30   ;;  %1369 = vst [vmem:[%s1863_s3 + $0xb0] sm:$0xff] %v1301_v31   ;;  %v452_v36 = vadd.f32 %v1454_v34, %v1698_v40  ;;  %v580_v37 = vadd.f32 %v1486_v35, %v1698_v40  ;;  %v647_v47 = vmax.f32 %v441_v32, 0.0 }
 0x108   :  { %v443_v41 = vpop.f32.mrf.mxu0  ;;  %v571_v42 = vpop.f32.mrf.mxu1  ;;  %v679_v48 = vmax.f32 %v569_v33, 0.0 }
 0x109   :  { %v650_v43 = vmax.f32 %v452_v36, 0.0  ;;  %v682_v44 = vmax.f32 %v580_v37, 0.0  ;;  %v444_v45 = vadd.f32 %v1698_v40, %v443_v41  ;;  %v572_v46 = vadd.f32 %v1698_v40, %v571_v42 }
 0x10a   :  { %v1457_v49 = vpop.f32.mrf.mxu0  ;;  %v1489_v50 = vpop.f32.mrf.mxu1 }
 0x10b   :  { %v1236_v51 = vpack.c.bf16 %v650_v43, %v649_v38  ;;  %v1316_v52 = vpack.c.bf16 %v682_v44, %v681_v39  ;;  %v648_v53 = vmax.f32 %v444_v45, 0.0  ;;  %v680_v54 = vmax.f32 %v572_v46, 0.0 }
 0x10c   :  { %v465_v55 = vadd.f32 %v1457_v49, %v1698_v40  ;;  %v593_v56 = vadd.f32 %v1489_v50, %v1698_v40  ;;  %v456_v57 = vpop.f32.mrf.mxu0  ;;  %v584_v58 = vpop.f32.mrf.mxu1 }
 0x10d   :  { %1356 = vst [vmem:[%s1863_s3 + $0x48] sm:$0xff] %v1236_v51   ;;  %1372 = vst [vmem:[%s1863_s3 + $0xc8] sm:$0xff] %v1316_v52   ;;  %v1231_v59 = vpack.c.bf16 %v648_v53, %v647_v47  ;;  %v1311_v60 = vpack.c.bf16 %v680_v54, %v679_v48  ;;  %v457_v61 = vadd.f32 %v1698_v40, %v456_v57 }
 0x10e   :  { %v585_v62 = vadd.f32 %v1698_v40, %v584_v58  ;;  %v1458_v63 = vpop.f32.mrf.mxu0  ;;  %v1490_v0 = vpop.f32.mrf.mxu1  ;;  %v653_v3 = vmax.f32 %v465_v55, 0.0  ;;  %v685_v4 = vmax.f32 %v593_v56, 0.0 }
 0x10f   :  { %1355 = vst [vmem:[%s1863_s3 + $0x40] sm:$0xff] %v1231_v59   ;;  %1371 = vst [vmem:[%s1863_s3 + $0xc0] sm:$0xff] %v1311_v60   ;;  %v468_v1 = vadd.f32 %v1458_v63, %v1698_v40  ;;  %v596_v2 = vadd.f32 %v1490_v0, %v1698_v40  ;;  %v651_v11 = vmax.f32 %v457_v61, 0.0 }
 0x110   :  { %v459_v5 = vpop.f32.mrf.mxu0  ;;  %v587_v6 = vpop.f32.mrf.mxu1  ;;  %v683_v12 = vmax.f32 %v585_v62, 0.0 }
 0x111   :  { %v654_v7 = vmax.f32 %v468_v1, 0.0  ;;  %v686_v8 = vmax.f32 %v596_v2, 0.0  ;;  %v460_v9 = vadd.f32 %v1698_v40, %v459_v5  ;;  %v588_v10 = vadd.f32 %v1698_v40, %v587_v6 }
 0x112   :  { %v1461_v13 = vpop.f32.mrf.mxu0  ;;  %v1493_v14 = vpop.f32.mrf.mxu1 }
 0x113   :  { %v1246_v15 = vpack.c.bf16 %v654_v7, %v653_v3  ;;  %v1326_v16 = vpack.c.bf16 %v686_v8, %v685_v4  ;;  %v652_v17 = vmax.f32 %v460_v9, 0.0  ;;  %v684_v18 = vmax.f32 %v588_v10, 0.0 }
 0x114   :  { %v481_v19 = vadd.f32 %v1461_v13, %v1698_v40  ;;  %v609_v20 = vadd.f32 %v1493_v14, %v1698_v40  ;;  %v472_v21 = vpop.f32.mrf.mxu0  ;;  %v600_v22 = vpop.f32.mrf.mxu1 }
 0x115   :  { %1358 = vst [vmem:[%s1863_s3 + $0x58] sm:$0xff] %v1246_v15   ;;  %1374 = vst [vmem:[%s1863_s3 + $0xd8] sm:$0xff] %v1326_v16   ;;  %v1241_v23 = vpack.c.bf16 %v652_v17, %v651_v11  ;;  %v1321_v24 = vpack.c.bf16 %v684_v18, %v683_v12  ;;  %v473_v25 = vadd.f32 %v1698_v40, %v472_v21 }
 0x116   :  { %v601_v26 = vadd.f32 %v1698_v40, %v600_v22  ;;  %v1462_v27 = vpop.f32.mrf.mxu0  ;;  %v1494_v28 = vpop.f32.mrf.mxu1  ;;  %v657_v31 = vmax.f32 %v481_v19, 0.0  ;;  %v689_v32 = vmax.f32 %v609_v20, 0.0 }
 0x117   :  { %1357 = vst [vmem:[%s1863_s3 + $0x50] sm:$0xff] %v1241_v23   ;;  %1373 = vst [vmem:[%s1863_s3 + $0xd0] sm:$0xff] %v1321_v24   ;;  %v484_v29 = vadd.f32 %v1462_v27, %v1698_v40  ;;  %v612_v30 = vadd.f32 %v1494_v28, %v1698_v40  ;;  %v655_v39 = vmax.f32 %v473_v25, 0.0 }
 0x118   :  { %v475_v33 = vpop.f32.mrf.mxu0  ;;  %v603_v34 = vpop.f32.mrf.mxu1  ;;  %v687_v41 = vmax.f32 %v601_v26, 0.0 }
 0x119   :  { %v658_v35 = vmax.f32 %v484_v29, 0.0  ;;  %v690_v36 = vmax.f32 %v612_v30, 0.0  ;;  %v476_v37 = vadd.f32 %v1698_v40, %v475_v33  ;;  %v604_v38 = vadd.f32 %v1698_v40, %v603_v34 }
 0x11a   :  { %v1465_v42 = vpop.f32.mrf.mxu0  ;;  %v1497_v43 = vpop.f32.mrf.mxu1 }
 0x11b   :  { %v1256_v44 = vpack.c.bf16 %v658_v35, %v657_v31  ;;  %v1336_v45 = vpack.c.bf16 %v690_v36, %v689_v32  ;;  %v656_v46 = vmax.f32 %v476_v37, 0.0  ;;  %v688_v47 = vmax.f32 %v604_v38, 0.0 }
 0x11c   :  { %v497_v48 = vadd.f32 %v1465_v42, %v1698_v40  ;;  %v625_v49 = vadd.f32 %v1497_v43, %v1698_v40  ;;  %v488_v50 = vpop.f32.mrf.mxu0  ;;  %v616_v51 = vpop.f32.mrf.mxu1 }
 0x11d   :  { %1360 = vst [vmem:[%s1863_s3 + $0x68] sm:$0xff] %v1256_v44   ;;  %1376 = vst [vmem:[%s1863_s3 + $0xe8] sm:$0xff] %v1336_v45   ;;  %v1251_v52 = vpack.c.bf16 %v656_v46, %v655_v39  ;;  %v1331_v53 = vpack.c.bf16 %v688_v47, %v687_v41  ;;  %v489_v54 = vadd.f32 %v1698_v40, %v488_v50 }
 0x11e   :  { %v617_v55 = vadd.f32 %v1698_v40, %v616_v51  ;;  %v1466_v56 = vpop.f32.mrf.mxu0  ;;  %v1498_v57 = vpop.f32.mrf.mxu1  ;;  %v661_v60 = vmax.f32 %v497_v48, 0.0  ;;  %v693_v61 = vmax.f32 %v625_v49, 0.0 }
 0x11f   :  { %1359 = vst [vmem:[%s1863_s3 + $0x60] sm:$0xff] %v1251_v52   ;;  %1375 = vst [vmem:[%s1863_s3 + $0xe0] sm:$0xff] %v1331_v53   ;;  %v500_v58 = vadd.f32 %v1466_v56, %v1698_v40  ;;  %v628_v59 = vadd.f32 %v1498_v57, %v1698_v40  ;;  %v659_v4 = vmax.f32 %v489_v54, 0.0 }
 0x120   :  { %v491_v62 = vpop.f32.mrf.mxu0  ;;  %v619_v63 = vpop.f32.mrf.mxu1  ;;  %v691_v5 = vmax.f32 %v617_v55, 0.0 }
 0x121   :  { %v662_v0 = vmax.f32 %v500_v58, 0.0  ;;  %v694_v1 = vmax.f32 %v628_v59, 0.0  ;;  %v492_v2 = vadd.f32 %v1698_v40, %v491_v62  ;;  %v620_v3 = vadd.f32 %v1698_v40, %v619_v63 }
 0x123   :  { %v1266_v6 = vpack.c.bf16 %v662_v0, %v661_v60  ;;  %v1346_v7 = vpack.c.bf16 %v694_v1, %v693_v61  ;;  %v660_v8 = vmax.f32 %v492_v2, 0.0  ;;  %v692_v9 = vmax.f32 %v620_v3, 0.0 }
 0x125   :  { %1362 = vst [vmem:[%s1863_s3 + $0x78] sm:$0xff] %v1266_v6   ;;  %1378 = vst [vmem:[%s1863_s3 + $0xf8] sm:$0xff] %v1346_v7   ;;  %v1261_v10 = vpack.c.bf16 %v660_v8, %v659_v4  ;;  %v1341_v11 = vpack.c.bf16 %v692_v9, %v691_v5 }
 0x127   :  { %1361 = vst [vmem:[%s1863_s3 + $0x70] sm:$0xff] %v1261_v10   ;;  %1377 = vst [vmem:[%s1863_s3 + $0xf0] sm:$0xff] %v1341_v11  }

</bundles_post_ra>
